<compile_context>
chip_gen: v7x
topology: tpu7x:2x2x1
jax: 0.10.0
libtpu: 0.0.40
codegen_flags: <defaults>
</compile_context>

<pallas_src>
import functools

import jax
import jax.numpy as jnp
from jax.experimental import pallas as pl
from jax.experimental.pallas import tpu as pltpu


LANES = 128
TARGET_BLOCK_BYTES = 4 * 1024 * 1024     # ~4 MiB per input block (per review)
CHUNK_ROWS = 1024                        # in-kernel compute chunk (f32 temps ~0.5 MiB)
VMEM_LIMIT_BYTES = 32 * 1024 * 1024      # 2 inputs x 4 MiB x 2 buffers + temps


def _round_up(x, m):
    return ((x + m - 1) // m) * m


def _sse_kernel(x_ref, t_ref, o_ref, *, n_rows, tile_rows, chunk_rows,
                tiles_per_core, n_tiles, need_mask, uneven):
    """Accumulate sum-of-squared-errors into a lane-resident (8,128) block."""
    p = pl.program_id(0)
    i = pl.program_id(1)
    t_lin = p * tiles_per_core + i
    n_chunks = tile_rows // chunk_rows

    @pl.when(i == 0)
    def _():
        o_ref[...] = jnp.zeros_like(o_ref)

    def tile_sse(masked):
        def chunk_body(c, acc):
            r0 = c * chunk_rows
            if not isinstance(c, int):
                r0 = pl.multiple_of(r0, chunk_rows)
            xs = x_ref[pl.ds(r0, chunk_rows), :].astype(jnp.float32)
            ts = t_ref[pl.ds(r0, chunk_rows), :].astype(jnp.float32)
            d = xs - ts
            if masked:
                # Zero rows of the ragged last tile that lie past the array.
                row_ids = (t_lin * tile_rows + r0
                           + jax.lax.broadcasted_iota(jnp.int32, d.shape, 0))
                d = jnp.where(row_ids < n_rows, d, 0.0)
            sq = d * d
            # Fold (chunk_rows,128) -> (chunk_rows//8, 8, 128) and reduce the
            # leading axis: pure VPU adds, partials stay sublane/lane resident.
            return acc + jnp.sum(sq.reshape(chunk_rows // 8, 8, LANES), axis=0)

        acc0 = jnp.zeros((8, LANES), jnp.float32)
        if n_chunks == 1:
            return chunk_body(0, acc0)
        return jax.lax.fori_loop(0, n_chunks, chunk_body, acc0)

    n_full = n_tiles - 1 if need_mask else n_tiles

    if need_mask or uneven:
        # Mask-free common path for all fully-in-range tiles.
        @pl.when(t_lin < n_full)
        def _():
            o_ref[0] += tile_sse(masked=False)

        if need_mask:
            # Masked path only for the (single) ragged last tile.
            @pl.when(t_lin == n_tiles - 1)
            def _():
                o_ref[0] += tile_sse(masked=True)
        # t_lin >= n_tiles (uneven 2-way split padding step): skipped entirely.
    else:
        o_ref[0] += tile_sse(masked=False)


def _sum_squared_error(x_hat, target):
    """Sum of squared differences over all elements (Pallas kernel + tiny JAX tail)."""
    assert x_hat.shape == target.shape
    n_elem = x_hat.size
    if n_elem == 0:
        return jnp.float32(0.0), 1
    itemsize = jnp.dtype(x_hat.dtype).itemsize

    x = x_hat.reshape(-1)
    t = target.reshape(-1)

    lane_rem = n_elem % LANES
    tail_sse = jnp.float32(0.0)
    if lane_rem:
        # Rare case (image tensors are normally 128-divisible): sum the <128
        # element tail in plain JAX; the prefix slice below is allowed to fuse
        # into the pallas_call (allow_input_fusion) to avoid an HBM copy.
        xt = x[n_elem - lane_rem:].astype(jnp.float32)
        tt = t[n_elem - lane_rem:].astype(jnp.float32)
        tail_sse = jnp.sum((xt - tt) ** 2)
        x = x[: n_elem - lane_rem]
        t = t[: n_elem - lane_rem]

    rows = (n_elem - lane_rem) // LANES
    if rows == 0:
        return tail_sse, n_elem

    x2 = x.reshape(rows, LANES)   # zero-copy for contiguous inputs
    t2 = t.reshape(rows, LANES)

    # Native sublane multiple for the input dtype (8 f32 / 16 bf16 / 32 int8).
    sub = max(8, 32 // itemsize)
    # ~4 MiB per input block; always a multiple of CHUNK_ROWS.
    target_rows = max(sub, TARGET_BLOCK_BYTES // (LANES * itemsize))

    if rows >= target_rows:
        tile_rows = target_rows
        chunk_rows = CHUNK_ROWS
    else:
        tile_rows = _round_up(rows, sub)
        if tile_rows > CHUNK_ROWS:
            tile_rows = _round_up(tile_rows, CHUNK_ROWS)
            chunk_rows = CHUNK_ROWS
        else:
            chunk_rows = tile_rows

    n_tiles = pl.cdiv(rows, tile_rows)

    # Always take the 2-way TensorCore split when there are >= 2 tiles (v7x
    # megacore); a possibly out-of-range trailing step is clamped + skipped.
    if n_tiles >= 2:
        p_axis = 2
        tiles_per_core = pl.cdiv(n_tiles, p_axis)
    else:
        p_axis = 1
        tiles_per_core = n_tiles
    uneven = (p_axis * tiles_per_core) != n_tiles
    need_mask = (n_tiles * tile_rows) != rows

    if uneven:
        def in_map(pp, ii):
            return (jnp.minimum(pp * tiles_per_core + ii, n_tiles - 1), 0)
    else:
        def in_map(pp, ii):
            return (pp * tiles_per_core + ii, 0)

    kernel = functools.partial(
        _sse_kernel,
        n_rows=rows, tile_rows=tile_rows, chunk_rows=chunk_rows,
        tiles_per_core=tiles_per_core, n_tiles=n_tiles,
        need_mask=need_mask, uneven=uneven)

    compiler_params = pltpu.CompilerParams(
        dimension_semantics=("parallel", "arbitrary"),
        vmem_limit_bytes=VMEM_LIMIT_BYTES,
        allow_input_fusion=[True, True] if lane_rem else None,
    )

    partials = pl.pallas_call(
        kernel,
        out_shape=jax.ShapeDtypeStruct((p_axis, 8, LANES), jnp.float32),
        grid_spec=pltpu.PrefetchScalarGridSpec(
            num_scalar_prefetch=0,
            grid=(p_axis, tiles_per_core),
            in_specs=[
                pl.BlockSpec((tile_rows, LANES), in_map),
                pl.BlockSpec((tile_rows, LANES), in_map),
            ],
            out_specs=pl.BlockSpec((1, 8, LANES), lambda pp, ii: (pp, 0, 0)),
        ),
        compiler_params=compiler_params,
        cost_estimate=pl.CostEstimate(
            flops=3 * n_elem,
            transcendentals=0,
            bytes_accessed=2 * rows * LANES * itemsize + p_axis * 8 * LANES * 4,
        ),
    )(x2, t2)

    return jnp.sum(partials) + tail_sse, n_elem


class RateDistortionLoss:
    """JAX/Pallas port of the PyTorch RateDistortionLoss module."""

    def __init__(self):
        # No learnable parameters; these mirror the PyTorch __init__.
        self.lambda_I = [117, 227, 435, 845, 1625, 3140]
        self.lambda_P = [85, 170, 380, 840]

    def __call__(self, output, target, lmbda, rd_weight=1):
        out = {}
        out['bpp_loss'] = output['bpp']
        sse, n = _sum_squared_error(output['x_hat'], target)
        out['mse_loss'] = sse / jnp.float32(n)          # nn.MSELoss() -> mean
        out['rd_loss'] = lmbda * out['mse_loss'] + out['bpp_loss']
        out['loss'] = rd_weight * out['rd_loss']
        return out


if __name__ == "__main__":
    key = jax.random.PRNGKey(0)
    k1, k2, k3, k4, k5, k6, k7, k8, k9 = jax.random.split(key, 9)

    loss_fn = RateDistortionLoss()
    lmbda = float(loss_fn.lambda_I[0])  # 117
    bpp = jax.random.uniform(k3, (), dtype=jnp.float32)  # scalar bpp loss

    def check(x_hat, target, rd_weight=1.0, rtol=1e-5, atol=1e-6):
        out = loss_fn({'x_hat': x_hat, 'bpp': bpp}, target, lmbda, rd_weight)
        jax.block_until_ready(out['loss'])
        mse_ref = jnp.mean((x_hat.astype(jnp.float32)
                            - target.astype(jnp.float32)) ** 2)
        rd_ref = lmbda * mse_ref + bpp
        assert jnp.allclose(out['mse_loss'], mse_ref, rtol=rtol, atol=atol)
        assert jnp.allclose(out['rd_loss'], rd_ref, rtol=rtol, atol=atol)
        assert jnp.allclose(out['loss'], rd_weight * rd_ref, rtol=rtol, atol=atol)

    # 1) Main example (NCHW 2x4x16x16): 128-divisible, mask-free fast path.
    x1 = jax.random.normal(k1, (2, 4, 16, 16), dtype=jnp.float32)
    t1 = jax.random.normal(k2, (2, 4, 16, 16), dtype=jnp.float32)
    check(x1, t1)

    # 2) Ragged row count (rows % 8 != 0): exercises the in-kernel last-tile mask.
    x2 = jax.random.normal(k4, (2, 3, 10, 128), dtype=jnp.float32)
    t2 = jax.random.normal(k5, (2, 3, 10, 128), dtype=jnp.float32)
    check(x2, t2, rd_weight=2.0)

    # 3) Element count not a multiple of 128: JAX tail + fusible wrapper slice.
    x3 = jax.random.normal(k6, (2, 3, 20, 20), dtype=jnp.float32)
    t3 = jax.random.normal(k7, (2, 3, 20, 20), dtype=jnp.float32)
    check(x3, t3, rd_weight=0.5)

    # 4) Multi-tile, odd tile count (rows=16640 -> n_tiles=3): uneven 2-way
    #    TensorCore split, clamped index_map, chunked inner loop, gated mask.
    x4 = jax.random.normal(k8, (2, 13, 80, 1024), dtype=jnp.float32)
    t4 = jax.random.normal(k9, (2, 13, 80, 1024), dtype=jnp.float32)
    check(x4, t4, rtol=1e-4, atol=1e-5)

    # 5) bf16 inputs: sublane multiple of 16, in-kernel f32 upcast.
    check(x1.astype(jnp.bfloat16), t1.astype(jnp.bfloat16))

    print("KERNEL_OK")
</pallas_src>

<mosaic_0001>
module attributes {stable_mosaic.version = 11 : i64} {
  func.func @_sse_kernel(%arg0: i32, %arg1: i32, %arg2: memref<16x128xf32, #tpu.memory_space<vmem>>, %arg3: memref<16x128xf32, #tpu.memory_space<vmem>>, %arg4: memref<1x8x128xf32, #tpu.memory_space<vmem>>) attributes {dimension_semantics = [#tpu.dimension_semantics<parallel>, #tpu.dimension_semantics<arbitrary>], iteration_bounds = array<i64: 1, 1>, scalar_prefetch = 0 : i64, scratch_operands = 0 : i64, tpu.core_type = #tpu.core_type<tc>, window_params = [{transform_indices = @transform_0, window_bounds = array<i64: 16, 128>}, {transform_indices = @transform_1, window_bounds = array<i64: 16, 128>}, {transform_indices = @transform_2, window_bounds = array<i64: 1, 8, 128>}]} {
    %c0_i32 = arith.constant 0 : i32
    %0 = arith.cmpi eq, %arg1, %c0_i32 : i32
    %1 = arith.extui %0 : i1 to i32
    %c0_i32_0 = arith.constant 0 : i32
    %2 = arith.cmpi ne, %1, %c0_i32_0 : i32
    scf.if %2 {
      %cst_11 = arith.constant 0.000000e+00 : f32
      %17 = vector.broadcast %cst_11 : f32 to vector<1x8x128xf32>
      %c0_12 = arith.constant 0 : index
      %c0_13 = arith.constant 0 : index
      %c0_14 = arith.constant 0 : index
      %18 = vector.load %arg4[%c0_12, %c0_13, %c0_14] : memref<1x8x128xf32, #tpu.memory_space<vmem>>, vector<1x8x128xf32>
      tpu.vector_store %arg4[%c0_12, %c0_13, %c0_14], %17 {strides = array<i32>} : memref<1x8x128xf32, #tpu.memory_space<vmem>>, vector<1x8x128xf32>,
    } else {
    }
    %c0 = arith.constant 0 : index
    %c0_1 = arith.constant 0 : index
    %c0_2 = arith.constant 0 : index
    %3 = vector.load %arg4[%c0, %c0_1, %c0_2] : memref<1x8x128xf32, #tpu.memory_space<vmem>>, vector<1x8x128xf32>
    %4 = vector.shape_cast %3 : vector<1x8x128xf32> to vector<8x128xf32>
    %cst = arith.constant 0.000000e+00 : f32
    %5 = vector.broadcast %cst : f32 to vector<8x128xf32>
    %c0_3 = arith.constant 0 : index
    %c0_4 = arith.constant 0 : index
    %6 = vector.load %arg2[%c0_3, %c0_4] : memref<16x128xf32, #tpu.memory_space<vmem>>, vector<16x128xf32>
    %c0_5 = arith.constant 0 : index
    %c0_6 = arith.constant 0 : index
    %7 = vector.load %arg3[%c0_5, %c0_6] : memref<16x128xf32, #tpu.memory_space<vmem>>, vector<16x128xf32>
    %8 = arith.subf %6, %7 : vector<16x128xf32>
    %9 = arith.mulf %8, %8 : vector<16x128xf32>
    %10 = vector.shape_cast %9 : vector<16x128xf32> to vector<2x8x128xf32>
    %cst_7 = arith.constant dense<0.000000e+00> : vector<8x128xf32>
    %11 = vector.multi_reduction <add>, %10, %cst_7 [0] : vector<2x8x128xf32> to vector<8x128xf32>
    %12 = arith.addf %5, %11 : vector<8x128xf32>
    %13 = arith.addf %4, %12 : vector<8x128xf32>
    %c0_8 = arith.constant 0 : index
    %c0_9 = arith.constant 0 : index
    %c0_10 = arith.constant 0 : index
    %14 = vector.load %arg4[%c0_8, %c0_9, %c0_10] : memref<1x8x128xf32, #tpu.memory_space<vmem>>, vector<1x8x128xf32>
    %15 = vector.shape_cast %14 : vector<1x8x128xf32> to vector<8x128xf32>
    %16 = vector.shape_cast %13 : vector<8x128xf32> to vector<1x8x128xf32>
    tpu.vector_store %arg4[%c0_8, %c0_9, %c0_10], %16 {strides = array<i32>} : memref<1x8x128xf32, #tpu.memory_space<vmem>>, vector<1x8x128xf32>,
    return
  }
  func.func @transform_0(%arg0: i32, %arg1: i32) -> (i32, i32) {
    %c1_i32 = arith.constant 1 : i32
    %0 = arith.muli %arg0, %c1_i32 : i32
    %1 = arith.addi %0, %arg1 : i32
    %c0_i32 = arith.constant 0 : i32
    %c0_i32_0 = arith.constant 0 : i32
    return %1, %c0_i32 : i32, i32
  }
  func.func @transform_1(%arg0: i32, %arg1: i32) -> (i32, i32) {
    %c1_i32 = arith.constant 1 : i32
    %0 = arith.muli %arg0, %c1_i32 : i32
    %1 = arith.addi %0, %arg1 : i32
    %c0_i32 = arith.constant 0 : i32
    %c0_i32_0 = arith.constant 0 : i32
    return %1, %c0_i32 : i32, i32
  }
  func.func @transform_2(%arg0: i32, %arg1: i32) -> (i32, i32, i32) {
    %c0_i32 = arith.constant 0 : i32
    %c0_i32_0 = arith.constant 0 : i32
    %c0_i32_1 = arith.constant 0 : i32
    return %arg0, %c0_i32, %c0_i32_0 : i32, i32, i32
  }
}

</mosaic_0001>

<bundles_post_ra>
// kernel: tpu_custom_call.1
= control target key start
LH: loop header
LB: loop body
LE: loop exit
PB: predicated region body
PF: predicated region fallthrough
CT: control target
= control target key end

     0   :  { %7 = vsyncpa [#allocation3], 0  ;;  %s220_s0 = inlined_call_operand.hbm [shape: f32[16,128], index: 0, kind: input, shape index: {}]   ;;  %s221_s1 = inlined_call_operand.hbm [shape: f32[16,128], index: 1, kind: input, shape index: {}]   ;;  %s222_s2 = inlined_call_operand.hbm [shape: f32[1,8,128], index: 2, kind: output, shape index: {}]  }
   0x1   :  { %8 = vsyncpa [#allocation6], 0 }
   0x2   :  { %9 = vsyncpa [#allocation4], 0  ;;  %s164_s9 = smov [#allocation2]   ;;  %s92_s13 = scalar_lea.hbm %s220_s0, 256 }
   0x3   :  { %s19_s10 = sshll.u32 %s164_s9, 4  ;;  %p93_p0 = scmp.ne.s32.totalorder %s220_s0, %s92_s13  ;;  %s20_s10 = int_to_ptr.vmem [resolvable:$true] %s19_s10 }
   0x4   :  { %p96_p1 = scmp.lt.u32.totalorder %s92_s13, %s220_s0 }
   0x6   :  { %p98_p2 = pnand %p96_p1, %p93_p0 }
   0x8   :  { %101 = shalt.err (!%p98_p2)
}
   0x9   :  { %s102_s18 = scalar_lea.vmem %s20_s10, 256  ;;  %p107_p4 = scmp.lt.s32.totalorder %s20_s10, %s20_s10 }
   0xa   :  { %p103_p3 = scmp.ne.s32.totalorder %s20_s10, %s102_s18  ;;  %p108_p5 = scmp.lt.s32.totalorder %s102_s18, %s102_s18 }
   0xc   :  { %p109_p6 = por %p108_p5, %p107_p4 }
   0xe   :  { %p110_p7 = pnand %p109_p6, %p103_p3 }
  0x10   :  { %113 = shalt.err (!%p110_p7)
}
  0x11   :  { %s165_s19 = smov 128   ;;  %s166_s20 = smov 8  }
  0x12   :  { %25 = dma.hbm_to_vmem [thread:$0]  %s220_s0, 256, %s20_s10, [#allocation3], %s165_s19, %s165_s19, %s166_s20  }
  0x13   :  { %s167_s23 = smov [#allocation5]   ;;  %s114_s27 = scalar_lea.hbm %s221_s1, 256 }
  0x14   :  { %s35_s24 = sshll.u32 %s167_s23, 4  ;;  %p115_p8 = scmp.ne.s32.totalorder %s221_s1, %s114_s27  ;;  %s36_s24 = int_to_ptr.vmem [resolvable:$true] %s35_s24 }
  0x15   :  { %p118_p9 = scmp.lt.u32.totalorder %s114_s27, %s221_s1 }
  0x17   :  { %p120_p10 = pnand %p118_p9, %p115_p8 }
  0x19   :  { %123 = shalt.err (!%p120_p10)
}
  0x1a   :  { %s124_s4 = scalar_lea.vmem %s36_s24, 256  ;;  %p129_p12 = scmp.lt.s32.totalorder %s36_s24, %s36_s24 }
  0x1b   :  { %p125_p11 = scmp.ne.s32.totalorder %s36_s24, %s124_s4  ;;  %p130_p13 = scmp.lt.s32.totalorder %s124_s4, %s124_s4 }
  0x1d   :  { %p131_p0 = por %p130_p13, %p129_p12 }
  0x1f   :  { %p132_p1 = pnand %p131_p0, %p125_p11 }
  0x21   :  { %135 = shalt.err (!%p132_p1)
}
  0x22   :  { %41 = dma.hbm_to_vmem [thread:$0]  %s221_s1, 256, %s36_s24, [#allocation6], %s165_s19, %s165_s19, %s166_s20  }
  0x23   :  { %158 = dma.done.wait [#allocation3], 256  }
  0x24   :  { %159 = vsyncadd [#allocation3], 4294967040 }
  0x25   :  { %160 = dma.done.wait [#allocation6], 256  }
  0x26   :  { %161 = vsyncadd [#allocation6], 4294967040  ;;  %v58_v0 = vld [vmem:[#allocation2] sm:$0xff]  ;;  %v59_v1 = vld [vmem:[#allocation2 + $0x8] sm:$0xff]  ;;  %s168_s6 = smov [#allocation7]  }
  0x27   :  { %v60_v2 = vld [vmem:[#allocation5] sm:$0xff]  ;;  %v61_v3 = vld [vmem:[#allocation5 + $0x8] sm:$0xff]  ;;  %s76_s7 = sshll.u32 %s168_s6, 4  ;;  %s77_s7 = int_to_ptr.vmem [resolvable:$true] %s76_s7 }
  0x28   :  { %v62_v4 = vsub.f32 %v58_v0, %v60_v2  ;;  %v63_v5 = vsub.f32 %v59_v1, %v61_v3  ;;  %s136_s8 = scalar_lea.vmem %s77_s7, 128  ;;  %p141_p3 = scmp.lt.s32.totalorder %s77_s7, %s77_s7 }
  0x29   :  { %p137_p2 = scmp.ne.s32.totalorder %s77_s7, %s136_s8  ;;  %p142_p4 = scmp.lt.s32.totalorder %s136_s8, %s136_s8 }
  0x2a   :  { %v64_v6 = vmul.f32 %v62_v4, %v62_v4  ;;  %v65_v7 = vmul.f32 %v63_v5, %v63_v5 }
  0x2b   :  { %p143_p5 = por %p142_p4, %p141_p3 }
  0x2c   :  { %v66_v8 = vadd.f32 %v65_v7, %v64_v6 }
  0x2d   :  { %p144_p6 = pnand %p143_p5, %p137_p2 }
  0x2e   :  { %69 = vst [vmem:[#allocation7] sm:$0xff] %v66_v8 }
  0x2f   :  { %147 = shalt.err (!%p144_p6)
}
  0x30   :  { %s148_s10 = scalar_lea.hbm %s222_s2, 128 }
  0x31   :  { %p149_p7 = scmp.ne.s32.totalorder %s222_s2, %s148_s10  ;;  %p152_p8 = scmp.lt.u32.totalorder %s148_s10, %s222_s2 }
  0x33   :  { %p154_p9 = pnand %p152_p8, %p149_p7 }
  0x35   :  { %157 = shalt.err (!%p154_p9)
}
  0x36   :  { %79 = dma.vmem_to_hbm [thread:$0]  %s77_s7, 128, %s222_s2, [#allocation4]  }
  0x37   :  { %162 = dma.done.wait [#allocation4], 128  }
  0x38   :  { %163 = vsyncadd [#allocation4], 4294967168 }
  0x39   :  { %83 = vsyncpa [#allocation3], 1 }
  0x3a   :  { %84 = vsyncpa [#allocation6], 1 }
  0x3b   :  { %85 = vsyncpa [#allocation4], 1 }

</bundles_post_ra>
